<compile_context>
chip_gen: v7x
topology: tpu7x:2x2x1
jax: 0.10.0
libtpu: 0.0.40
codegen_flags: <defaults>
</compile_context>

<pallas_src>
import functools
import math

import jax
import jax.numpy as jnp
from jax.experimental import pallas as pl
from jax.experimental.pallas import tpu as pltpu


def _round_up(x, m):
    return ((x + m - 1) // m) * m


def _support_kernel(x_ref, w_ref, s_ref, acc_ref):
    """support[i_tile] = sum_k X[i_tile, k_tile] @ W[k_tile, :]."""
    k = pl.program_id(1)

    @pl.when(k == 0)
    def _():
        acc_ref[...] = jnp.zeros_like(acc_ref)

    acc_ref[...] += jnp.dot(x_ref[...], w_ref[...],
                            preferred_element_type=jnp.float32)

    @pl.when(k == pl.num_programs(1) - 1)
    def _():
        s_ref[...] = acc_ref[...].astype(s_ref.dtype)


def _aggregate_kernel(adj_ref, s_ref, b_ref, o_ref, acc_ref):
    """out[i_tile] = sum_k A[i_tile, k_tile] @ support[k_tile, :] + bias."""
    k = pl.program_id(1)

    @pl.when(k == 0)
    def _():
        acc_ref[...] = jnp.zeros_like(acc_ref)

    acc_ref[...] += jnp.dot(adj_ref[...], s_ref[...],
                            preferred_element_type=jnp.float32)

    @pl.when(k == pl.num_programs(1) - 1)
    def _():
        o_ref[...] = (acc_ref[...] + b_ref[...]).astype(o_ref.dtype)


@functools.partial(jax.jit, static_argnames=("tm", "tk"))
def graph_convolution(adjacency, x, weight, bias=None, *, tm=256, tk=256):
    """adjacency: [N, N], x: [N, D_in], weight: [D_in, D_out], bias: [D_out] or None."""
    num_nodes, input_dim = x.shape
    output_dim = weight.shape[1]

    if bias is None:
        # use_bias=False path: same math with a zero bias.
        bias = jnp.zeros((output_dim,), dtype=jnp.float32)

    # Lane-dense padding: feature dims to multiples of 128; node dim padded so
    # both the row tile (tm) and the reduction tile (tk) divide it exactly.
    # Zero padding leaves the math unchanged; padding is sliced away at the end.
    d_in_p = _round_up(input_dim, 128)
    d_out_p = _round_up(output_dim, 128)
    n_tile = (tm * tk) // math.gcd(tm, tk)  # lcm(tm, tk)
    n_p = _round_up(num_nodes, n_tile)

    # Reduction tile over D_in for stage 1 (always divides d_in_p).
    if d_in_p % 512 == 0:
        tki = 512
    elif d_in_p % 256 == 0:
        tki = 256
    else:
        tki = 128

    adj_p = jnp.pad(adjacency.astype(jnp.float32),
                    ((0, n_p - num_nodes), (0, n_p - num_nodes))
                    ).astype(jnp.bfloat16)
    x_p = jnp.pad(x.astype(jnp.float32),
                  ((0, n_p - num_nodes), (0, d_in_p - input_dim))
                  ).astype(jnp.bfloat16)
    w_p = jnp.pad(weight.astype(jnp.float32),
                  ((0, d_in_p - input_dim), (0, d_out_p - output_dim))
                  ).astype(jnp.bfloat16)
    b_p = jnp.pad(bias.astype(jnp.float32),
                  (0, d_out_p - output_dim)).reshape(1, d_out_p)

    # ---------------- Stage 1: support = X @ W  (computed exactly once) -----
    grid1 = (n_p // tm, d_in_p // tki)
    support = pl.pallas_call(
        _support_kernel,
        out_shape=jax.ShapeDtypeStruct((n_p, d_out_p), jnp.bfloat16),
        grid_spec=pltpu.PrefetchScalarGridSpec(
            num_scalar_prefetch=0,
            grid=grid1,
            in_specs=[
                pl.BlockSpec((tm, tki), lambda i, k: (i, k)),        # X tile
                pl.BlockSpec((tki, d_out_p), lambda i, k: (k, 0)),   # W tile
            ],
            out_specs=pl.BlockSpec((tm, d_out_p), lambda i, k: (i, 0)),
            scratch_shapes=[pltpu.VMEM((tm, d_out_p), jnp.float32)],
        ),
        compiler_params=pltpu.CompilerParams(
            dimension_semantics=("parallel", "arbitrary"),
            vmem_limit_bytes=32 * 1024 * 1024,
        ),
        cost_estimate=pl.CostEstimate(
            flops=int(2 * n_p * d_in_p * d_out_p),
            transcendentals=0,
            bytes_accessed=int(x_p.size * 2
                               + w_p.size * 2 * grid1[0]
                               + n_p * d_out_p * 2),
        ),
    )(x_p, w_p)

    # ---------------- Stage 2: out = A @ support + bias ---------------------
    grid2 = (n_p // tm, n_p // tk)
    out_p = pl.pallas_call(
        _aggregate_kernel,
        out_shape=jax.ShapeDtypeStruct((n_p, d_out_p), jnp.float32),
        grid_spec=pltpu.PrefetchScalarGridSpec(
            num_scalar_prefetch=0,
            grid=grid2,
            in_specs=[
                pl.BlockSpec((tm, tk), lambda i, k: (i, k)),          # A tile
                pl.BlockSpec((tk, d_out_p), lambda i, k: (k, 0)),     # support slab
                pl.BlockSpec((1, d_out_p), lambda i, k: (0, 0)),      # bias
            ],
            out_specs=pl.BlockSpec((tm, d_out_p), lambda i, k: (i, 0)),
            scratch_shapes=[pltpu.VMEM((tm, d_out_p), jnp.float32)],
        ),
        compiler_params=pltpu.CompilerParams(
            dimension_semantics=("parallel", "arbitrary"),
            vmem_limit_bytes=32 * 1024 * 1024,
        ),
        cost_estimate=pl.CostEstimate(
            flops=int(2 * n_p * n_p * d_out_p),
            transcendentals=0,
            bytes_accessed=int(adj_p.size * 2
                               + n_p * d_out_p * 2 * grid2[0]
                               + b_p.size * 4
                               + n_p * d_out_p * 4),
        ),
    )(adj_p, support, b_p)

    return out_p[:num_nodes, :output_dim]


if __name__ == "__main__":
    key = jax.random.PRNGKey(0)
    k_adj, k_x, k_w = jax.random.split(key, 3)

    num_nodes = 300     # pads to 512 -> grids exercise both accumulation axes
    input_dim = 32
    output_dim = 16

    # Node features.
    x = jax.random.normal(k_x, (num_nodes, input_dim), dtype=jnp.float32)

    # Row-normalized dense adjacency with self-loops.
    adj_raw = (jax.random.uniform(k_adj, (num_nodes, num_nodes)) > 0.9).astype(jnp.float32)
    adj = adj_raw + jnp.eye(num_nodes, dtype=jnp.float32)
    deg = jnp.sum(adj, axis=1, keepdims=True)
    adj = adj / deg

    # kaiming_normal_-style init for weight (torch fan_in = weight.size(1)),
    # zeros for bias (matching __init_parameters).
    fan_in = output_dim
    std = math.sqrt(2.0 / fan_in)
    weight = std * jax.random.normal(k_w, (input_dim, output_dim), dtype=jnp.float32)
    bias = jnp.zeros((output_dim,), dtype=jnp.float32)

    out = graph_convolution(adj, x, weight, bias)
    out = jax.block_until_ready(out)
    assert out.shape == (num_nodes, output_dim)

    # Reference 1: bf16-input reference (same operand rounding as the kernel,
    # including the bf16 support intermediate).
    adj_bf = adj.astype(jnp.bfloat16).astype(jnp.float32)
    x_bf = x.astype(jnp.bfloat16).astype(jnp.float32)
    w_bf = weight.astype(jnp.bfloat16).astype(jnp.float32)
    support_bf = (x_bf @ w_bf).astype(jnp.bfloat16).astype(jnp.float32)
    ref_bf16 = adj_bf @ support_bf + bias
    assert jnp.allclose(out, ref_bf16, atol=1e-2, rtol=1e-2), "mismatch vs bf16-input reference"

    # Reference 2: original f32 math (looser tolerance due to bf16 operands).
    ref_f32 = adj @ (x @ weight) + bias
    assert jnp.allclose(out, ref_f32, atol=5e-2, rtol=5e-2), "mismatch vs f32 reference"

    print("KERNEL_OK")
</pallas_src>

<mosaic_0001>
module attributes {stable_mosaic.version = 11 : i64} {
  func.func @_support_kernel(%arg0: i32, %arg1: i32, %arg2: memref<256x128xbf16, #tpu.memory_space<vmem>>, %arg3: memref<128x128xbf16, #tpu.memory_space<vmem>>, %arg4: memref<256x128xbf16, #tpu.memory_space<vmem>>, %arg5: memref<256x128xf32, #tpu.memory_space<vmem>>) attributes {dimension_semantics = [#tpu.dimension_semantics<parallel>, #tpu.dimension_semantics<arbitrary>], iteration_bounds = array<i64: 2, 1>, scalar_prefetch = 0 : i64, scratch_operands = 1 : i64, tpu.core_type = #tpu.core_type<tc>, window_params = [{transform_indices = @transform_0, window_bounds = array<i64: 256, 128>}, {transform_indices = @transform_1, window_bounds = array<i64: 128, 128>}, {transform_indices = @transform_2, window_bounds = array<i64: 256, 128>}]} {
    %c0_i32 = arith.constant 0 : i32
    %0 = arith.cmpi eq, %arg1, %c0_i32 : i32
    %1 = arith.extui %0 : i1 to i32
    %c0_i32_0 = arith.constant 0 : i32
    %2 = arith.cmpi ne, %1, %c0_i32_0 : i32
    scf.if %2 {
      %cst_10 = arith.constant 0.000000e+00 : f32
      %12 = vector.broadcast %cst_10 : f32 to vector<256x128xf32>
      %c0_11 = arith.constant 0 : index
      %c0_12 = arith.constant 0 : index
      %13 = vector.load %arg5[%c0_11, %c0_12] : memref<256x128xf32, #tpu.memory_space<vmem>>, vector<256x128xf32>
      tpu.vector_store %arg5[%c0_11, %c0_12], %12 {strides = array<i32>} : memref<256x128xf32, #tpu.memory_space<vmem>>, vector<256x128xf32>,
    } else {
    }
    %c0 = arith.constant 0 : index
    %c0_1 = arith.constant 0 : index
    %3 = vector.load %arg5[%c0, %c0_1] : memref<256x128xf32, #tpu.memory_space<vmem>>, vector<256x128xf32>
    %c0_2 = arith.constant 0 : index
    %c0_3 = arith.constant 0 : index
    %4 = vector.load %arg2[%c0_2, %c0_3] : memref<256x128xbf16, #tpu.memory_space<vmem>>, vector<256x128xbf16>
    %c0_4 = arith.constant 0 : index
    %c0_5 = arith.constant 0 : index
    %5 = vector.load %arg3[%c0_4, %c0_5] : memref<128x128xbf16, #tpu.memory_space<vmem>>, vector<128x128xbf16>
    %cst = arith.constant dense<0.000000e+00> : vector<256x128xf32>
    %6 = tpu.matmul %4, %5, %cst {dimension_numbers = #tpu.dot_dimension_numbers<[1], [0], [0], [1], [0, 0, 1, 1], [], []>} : vector<256x128xbf16>, vector<128x128xbf16>, vector<256x128xf32> -> vector<256x128xf32>
    %7 = arith.addf %3, %6 : vector<256x128xf32>
    %c0_6 = arith.constant 0 : index
    %c0_7 = arith.constant 0 : index
    %8 = vector.load %arg5[%c0_6, %c0_7] : memref<256x128xf32, #tpu.memory_space<vmem>>, vector<256x128xf32>
    tpu.vector_store %arg5[%c0_6, %c0_7], %7 {strides = array<i32>} : memref<256x128xf32, #tpu.memory_space<vmem>>, vector<256x128xf32>,
    %c0_i32_8 = arith.constant 0 : i32
    %9 = arith.cmpi eq, %arg1, %c0_i32_8 : i32
    %10 = arith.extui %9 : i1 to i32
    %c0_i32_9 = arith.constant 0 : i32
    %11 = arith.cmpi ne, %10, %c0_i32_9 : i32
    scf.if %11 {
      %c0_10 = arith.constant 0 : index
      %c0_11 = arith.constant 0 : index
      %12 = vector.load %arg5[%c0_10, %c0_11] : memref<256x128xf32, #tpu.memory_space<vmem>>, vector<256x128xf32>
      %13 = arith.truncf %12 : vector<256x128xf32> to vector<256x128xbf16>
      %c0_12 = arith.constant 0 : index
      %c0_13 = arith.constant 0 : index
      %14 = vector.load %arg4[%c0_12, %c0_13] : memref<256x128xbf16, #tpu.memory_space<vmem>>, vector<256x128xbf16>
      tpu.vector_store %arg4[%c0_12, %c0_13], %13 {strides = array<i32>} : memref<256x128xbf16, #tpu.memory_space<vmem>>, vector<256x128xbf16>,
    } else {
    }
    return
  }
  func.func @transform_0(%arg0: i32, %arg1: i32) -> (i32, i32) {
    %c0_i32 = arith.constant 0 : i32
    return %arg0, %arg1 : i32, i32
  }
  func.func @transform_1(%arg0: i32, %arg1: i32) -> (i32, i32) {
    %c0_i32 = arith.constant 0 : i32
    %c0_i32_0 = arith.constant 0 : i32
    return %arg1, %c0_i32 : i32, i32
  }
  func.func @transform_2(%arg0: i32, %arg1: i32) -> (i32, i32) {
    %c0_i32 = arith.constant 0 : i32
    %c0_i32_0 = arith.constant 0 : i32
    return %arg0, %c0_i32 : i32, i32
  }
}

module attributes {stable_mosaic.version = 11 : i64} {
  func.func @_aggregate_kernel(%arg0: i32, %arg1: i32, %arg2: memref<256x256xbf16, #tpu.memory_space<vmem>>, %arg3: memref<256x128xbf16, #tpu.memory_space<vmem>>, %arg4: memref<1x128xf32, #tpu.memory_space<vmem>>, %arg5: memref<256x128xf32, #tpu.memory_space<vmem>>, %arg6: memref<256x128xf32, #tpu.memory_space<vmem>>) attributes {dimension_semantics = [#tpu.dimension_semantics<parallel>, #tpu.dimension_semantics<arbitrary>], iteration_bounds = array<i64: 2, 2>, scalar_prefetch = 0 : i64, scratch_operands = 1 : i64, tpu.core_type = #tpu.core_type<tc>, window_params = [{transform_indices = @transform_0, window_bounds = array<i64: 256, 256>}, {transform_indices = @transform_1, window_bounds = array<i64: 256, 128>}, {pipeline_mode = #tpu.pipeline_mode<synchronous>, transform_indices = @transform_2, window_bounds = array<i64: 1, 128>}, {transform_indices = @transform_3, window_bounds = array<i64: 256, 128>}]} {
    %c0_i32 = arith.constant 0 : i32
    %0 = arith.cmpi eq, %arg1, %c0_i32 : i32
    %1 = arith.extui %0 : i1 to i32
    %c0_i32_0 = arith.constant 0 : i32
    %2 = arith.cmpi ne, %1, %c0_i32_0 : i32
    scf.if %2 {
      %cst_9 = arith.constant 0.000000e+00 : f32
      %12 = vector.broadcast %cst_9 : f32 to vector<256x128xf32>
      %c0_10 = arith.constant 0 : index
      %c0_11 = arith.constant 0 : index
      %13 = vector.load %arg6[%c0_10, %c0_11] : memref<256x128xf32, #tpu.memory_space<vmem>>, vector<256x128xf32>
      tpu.vector_store %arg6[%c0_10, %c0_11], %12 {strides = array<i32>} : memref<256x128xf32, #tpu.memory_space<vmem>>, vector<256x128xf32>,
    } else {
    }
    %c0 = arith.constant 0 : index
    %c0_1 = arith.constant 0 : index
    %3 = vector.load %arg6[%c0, %c0_1] : memref<256x128xf32, #tpu.memory_space<vmem>>, vector<256x128xf32>
    %c0_2 = arith.constant 0 : index
    %c0_3 = arith.constant 0 : index
    %4 = vector.load %arg2[%c0_2, %c0_3] : memref<256x256xbf16, #tpu.memory_space<vmem>>, vector<256x256xbf16>
    %c0_4 = arith.constant 0 : index
    %c0_5 = arith.constant 0 : index
    %5 = vector.load %arg3[%c0_4, %c0_5] : memref<256x128xbf16, #tpu.memory_space<vmem>>, vector<256x128xbf16>
    %cst = arith.constant dense<0.000000e+00> : vector<256x128xf32>
    %6 = tpu.matmul %4, %5, %cst {dimension_numbers = #tpu.dot_dimension_numbers<[1], [0], [0], [1], [0, 0, 1, 1], [], []>} : vector<256x256xbf16>, vector<256x128xbf16>, vector<256x128xf32> -> vector<256x128xf32>
    %7 = arith.addf %3, %6 : vector<256x128xf32>
    %c0_6 = arith.constant 0 : index
    %c0_7 = arith.constant 0 : index
    %8 = vector.load %arg6[%c0_6, %c0_7] : memref<256x128xf32, #tpu.memory_space<vmem>>, vector<256x128xf32>
    tpu.vector_store %arg6[%c0_6, %c0_7], %7 {strides = array<i32>} : memref<256x128xf32, #tpu.memory_space<vmem>>, vector<256x128xf32>,
    %c1_i32 = arith.constant 1 : i32
    %9 = arith.cmpi eq, %arg1, %c1_i32 : i32
    %10 = arith.extui %9 : i1 to i32
    %c0_i32_8 = arith.constant 0 : i32
    %11 = arith.cmpi ne, %10, %c0_i32_8 : i32
    scf.if %11 {
      %c0_9 = arith.constant 0 : index
      %c0_10 = arith.constant 0 : index
      %12 = vector.load %arg6[%c0_9, %c0_10] : memref<256x128xf32, #tpu.memory_space<vmem>>, vector<256x128xf32>
      %c0_11 = arith.constant 0 : index
      %c0_12 = arith.constant 0 : index
      %13 = vector.load %arg4[%c0_11, %c0_12] : memref<1x128xf32, #tpu.memory_space<vmem>>, vector<1x128xf32>
      %14 = vector.broadcast %13 : vector<1x128xf32> to vector<256x128xf32>
      %15 = arith.addf %12, %14 : vector<256x128xf32>
      %c0_13 = arith.constant 0 : index
      %c0_14 = arith.constant 0 : index
      %16 = vector.load %arg5[%c0_13, %c0_14] : memref<256x128xf32, #tpu.memory_space<vmem>>, vector<256x128xf32>
      tpu.vector_store %arg5[%c0_13, %c0_14], %15 {strides = array<i32>} : memref<256x128xf32, #tpu.memory_space<vmem>>, vector<256x128xf32>,
    } else {
    }
    return
  }
  func.func @transform_0(%arg0: i32, %arg1: i32) -> (i32, i32) {
    %c0_i32 = arith.constant 0 : i32
    return %arg0, %arg1 : i32, i32
  }
  func.func @transform_1(%arg0: i32, %arg1: i32) -> (i32, i32) {
    %c0_i32 = arith.constant 0 : i32
    %c0_i32_0 = arith.constant 0 : i32
    return %arg1, %c0_i32 : i32, i32
  }
  func.func @transform_2(%arg0: i32, %arg1: i32) -> (i32, i32) {
    %c0_i32 = arith.constant 0 : i32
    %c0_i32_0 = arith.constant 0 : i32
    %c0_i32_1 = arith.constant 0 : i32
    return %c0_i32, %c0_i32_0 : i32, i32
  }
  func.func @transform_3(%arg0: i32, %arg1: i32) -> (i32, i32) {
    %c0_i32 = arith.constant 0 : i32
    %c0_i32_0 = arith.constant 0 : i32
    return %arg0, %c0_i32 : i32, i32
  }
}

</mosaic_0001>

<bundles_post_ra>
// kernel: graph_convolution.2
= control target key start
LH: loop header
LB: loop body
LE: loop exit
PB: predicated region body
PF: predicated region fallthrough
CT: control target
= control target key end

     0   :  { %s1326_s9 = smov 0   ;;  %s1328_s10 = smov 0   ;;  %s1426_s0 = inlined_call_operand.vmem [shape: bf16[512,128], index: 0, kind: input, shape index: {}]   ;;  %s1427_s1 = inlined_call_operand.vmem [shape: bf16[128,128], index: 1, kind: input, shape index: {}]   ;;  %s1428_s2 = inlined_call_operand.vmem [shape: bf16[512,128], index: 2, kind: output, shape index: {}]  }
   0x1   :  { %s1330_s11 = smov 0  }
   0x2 LB: > { %s24_s12 = sadd.s32 1, %s1305_s10  ;;  %p961_p0 = scmp.ge.s32.totalorder %s1309_s11, 1  ;;  %s1309_s11 = sphi %s1330_s11, %s12_s11   ;;  %s1305_s10 = sphi %s1328_s10, %s1430_s10   ;;  %s1301_s9 = sphi %s1326_s9, %s1429_s9  }
   0x3   : > { %p26_p1 = scmp.ge.s32.totalorder %s24_s12, 2  ;;  %p141_p2 = scmp.lt.s32.totalorder %s1309_s11, 3 }
   0x5   : > { %s1432_s12 = smov (%p26_p1, %s24_s12), 0  ;;  %p142_p3 = pnand %p961_p0, %p141_p2 }
   0x6   : > { %v1263_v0 = vld [vmem:[%s1427_s1] sm:$0xff] (!%p142_p3)   ;;  %s962_s15 = sshll.u32 (!%p142_p3), %s1301_s9, 5  ;;  %v1264_v1 = vld [vmem:[%s1427_s1 + $0x8] sm:$0xff] (!%p142_p3)   ;;  %v1265_v2 = vld [vmem:[%s1427_s1 + $0x10] sm:$0xff] (!%p142_p3)  }
   0x7   : > { %145 = sbr.rel (%p142_p3) target bundleno = 281 (0x119), region = 28  ;;  %p172_p4 = scmp.lt.s32.totalorder (!%p142_p3), %s962_s15, 63  ;;  %1175 = vmatprep.subr.bf16.mxu0 (!%p142_p3), %v1263_v0  ;;  %1223 = vmatprep.subr.bf16.mxu1 (!%p142_p3), %v1263_v0  ;;  %v1266_v3 = vld [vmem:[%s1427_s1 + $0x18] sm:$0xff] (!%p142_p3)   ;;  %v1267_v6 = vld [vmem:[%s1427_s1 + $0x20] sm:$0xff] (!%p142_p3)   ;;  %v1268_v7 = vld [vmem:[%s1427_s1 + $0x28] sm:$0xff] (!%p142_p3)  }
   0x8   : > { %1176 = vmatpush3.bf16.msra.mxu0 (!%p142_p3), %v1263_v0  ;;  %1231 = vmatpush3.bf16.msra.mxu1 (!%p142_p3), %v1263_v0  ;;  %v1269_v8 = vld [vmem:[%s1427_s1 + $0x30] sm:$0xff] (!%p142_p3)   ;;  %v1270_v9 = vld [vmem:[%s1427_s1 + $0x38] sm:$0xff] (!%p142_p3)  }
   0x9   : > { %1177 = vmatprep.subr.bf16.mxu0 (!%p142_p3), %v1264_v1  ;;  %1224 = vmatprep.subr.bf16.mxu1 (!%p142_p3), %v1264_v1 }
   0xc   : > { %1178 = vmatpush3.bf16.msra.mxu0 (!%p142_p3), %v1264_v1  ;;  %1232 = vmatpush3.bf16.msra.mxu1 (!%p142_p3), %v1264_v1 }
   0xd   : > { %1179 = vmatprep.subr.bf16.mxu0 (!%p142_p3), %v1265_v2  ;;  %1225 = vmatprep.subr.bf16.mxu1 (!%p142_p3), %v1265_v2 }
   0xe   : > { %s1434_s15 = smov (!%p172_p4, %s962_s15), 63 }
   0xf   : > { %s963_s20 = sshll.u32 %s1434_s15, 2 }
  0x10   : > { %s1361_s23 = scalar_lea.vmem %s1426_s0, %s963_s20  ;;  %1180 = vmatpush3.bf16.msra.mxu0 %v1265_v2  ;;  %1233 = vmatpush3.bf16.msra.mxu1 %v1265_v2  ;;  %s1399_s8 = scalar_lea.vmem %s1428_s2, %s963_s20 }
  0x11   : > { %v1271_v4 = vld [vmem:[%s1361_s23] sm:$0xff]   ;;  %1181 = vmatprep.subr.bf16.mxu0 %v1266_v3  ;;  %1226 = vmatprep.subr.bf16.mxu1 %v1266_v3  ;;  %v1273_v10 = vld [vmem:[%s1361_s23 + $0x8] sm:$0xff]   ;;  %v1275_v12 = vld [vmem:[%s1361_s23 + $0x10] sm:$0xff]  }
  0x12   : > { %v1272_v5 = vld [vmem:[%s1361_s23 + $0x40] sm:$0xff]   ;;  %1191 = vmatprep.mubr.bf16.mxu0 %v1271_v4  ;;  %v1274_v11 = vld [vmem:[%s1361_s23 + $0x48] sm:$0xff]   ;;  %v1276_v13 = vld [vmem:[%s1361_s23 + $0x50] sm:$0xff]  }
  0x13   : > { %1207 = vmatprep.mubr.bf16.mxu1 %v1272_v5  ;;  %v1277_v14 = vld [vmem:[%s1361_s23 + $0x18] sm:$0xff]   ;;  %v1279_v16 = vld [vmem:[%s1361_s23 + $0x20] sm:$0xff]   ;;  %v1281_v18 = vld [vmem:[%s1361_s23 + $0x28] sm:$0xff]  }
  0x14   : > { %1182 = vmatpush3.bf16.msra.mxu0 %v1266_v3  ;;  %1234 = vmatpush3.bf16.msra.mxu1 %v1266_v3  ;;  %v1278_v15 = vld [vmem:[%s1361_s23 + $0x58] sm:$0xff]   ;;  %v1280_v17 = vld [vmem:[%s1361_s23 + $0x60] sm:$0xff]   ;;  %v1282_v19 = vld [vmem:[%s1361_s23 + $0x68] sm:$0xff]  }
  0x15   : > { %1183 = vmatprep.subr.bf16.mxu0 %v1267_v6  ;;  %1227 = vmatprep.subr.bf16.mxu1 %v1267_v6  ;;  %v1283_v20 = vld [vmem:[%s1361_s23 + $0x30] sm:$0xff]   ;;  %v1285_v22 = vld [vmem:[%s1361_s23 + $0x38] sm:$0xff]  }
  0x16   : > { %v1284_v21 = vld [vmem:[%s1361_s23 + $0x70] sm:$0xff]   ;;  %v1286_v23 = vld [vmem:[%s1361_s23 + $0x78] sm:$0xff]  }
  0x18   : > { %1184 = vmatpush3.bf16.msra.mxu0 %v1267_v6  ;;  %1235 = vmatpush3.bf16.msra.mxu1 %v1267_v6 }
  0x19   : > { %1185 = vmatprep.subr.bf16.mxu0 %v1268_v7  ;;  %1228 = vmatprep.subr.bf16.mxu1 %v1268_v7 }
  0x1c   : > { %1186 = vmatpush3.bf16.msra.mxu0 %v1268_v7  ;;  %1236 = vmatpush3.bf16.msra.mxu1 %v1268_v7 }
  0x1d   : > { %1187 = vmatprep.subr.bf16.mxu0 %v1269_v8  ;;  %1229 = vmatprep.subr.bf16.mxu1 %v1269_v8 }
  0x20   : > { %1188 = vmatpush3.bf16.msra.mxu0 %v1269_v8  ;;  %1237 = vmatpush3.bf16.msra.mxu1 %v1269_v8 }
  0x21   : > { %1189 = vmatprep.subr.bf16.mxu0 %v1270_v9  ;;  %1230 = vmatprep.subr.bf16.mxu1 %v1270_v9 }
  0x24   : > { %1190 = vmatpush3.bf16.msra.mxu0 %v1270_v9  ;;  %1238 = vmatpush3.bf16.msra.mxu1 %v1270_v9 }
  0x27   : > { %1192 = vmatmul.mubr.bf16.vlgmr.msra.gmra.mrb[0].mxu0 %v1273_v10  ;;  %1208 = vmatmul.mubr.bf16.vlgmr.msra.gmra.mrb[0].mxu1 %v1274_v11 }
  0x28   : > { %1195 = vmatprep.mubr.bf16.mxu0 %v1275_v12  ;;  %1211 = vmatprep.mubr.bf16.mxu1 %v1276_v13 }
  0x2f   : > { %1196 = vmatmul.mubr.bf16.gmra.mrb[4].mxu0 %v1277_v14  ;;  %1212 = vmatmul.mubr.bf16.gmra.mrb[4].mxu1 %v1278_v15 }
  0x30   : > { %1199 = vmatprep.mubr.bf16.mxu0 %v1279_v16  ;;  %1215 = vmatprep.mubr.bf16.mxu1 %v1280_v17 }
  0x37   : > { %1200 = vmatmul.mubr.bf16.gmra.mrb[8].mxu0 %v1281_v18  ;;  %1216 = vmatmul.mubr.bf16.gmra.mrb[8].mxu1 %v1282_v19 }
  0x38   : > { %1203 = vmatprep.mubr.bf16.mxu0 %v1283_v20  ;;  %1219 = vmatprep.mubr.bf16.mxu1 %v1284_v21 }
  0x3f   : > { %1204 = vmatmul.mubr.bf16.gmra.mrb[12].mxu0 %v1285_v22  ;;  %1220 = vmatmul.mubr.bf16.gmra.mrb[12].mxu1 %v1286_v23 }
  0xfa   : > { %v1193_v24 = vpop.f32.mrb[0].mxu0  ;;  %v1209_v25 = vpop.f32.mrb[0].mxu1 }
  0xfb   : > { %v487_v26 = vpop.f32.mrb[1].mxu0  ;;  %v551_v27 = vpop.f32.mrb[1].mxu1 }
  0xfc   : > { %v1194_v28 = vpop.f32.mrb[2].mxu0  ;;  %v1210_v29 = vpop.f32.mrb[2].mxu1 }
  0xfd   : > { %v1064_v30 = vpack.c.bf16 %v1194_v28, %v1193_v24  ;;  %v1104_v31 = vpack.c.bf16 %v1210_v29, %v1209_v25  ;;  %v490_v32 = vpop.f32.mrb[3].mxu0  ;;  %v554_v33 = vpop.f32.mrb[3].mxu1 }
  0xfe   : > { %v1059_v34 = vpack.c.bf16 %v490_v32, %v487_v26  ;;  %v1099_v35 = vpack.c.bf16 %v554_v33, %v551_v27 }
  0xff   : > { %1136 = vst [vmem:[%s1399_s8 + $0x8] sm:$0xff] %v1064_v30   ;;  %1144 = vst [vmem:[%s1399_s8 + $0x48] sm:$0xff] %v1104_v31  }
 0x100   : > { %1060 = vst [vmem:[%s1399_s8] sm:$0xff] %v1059_v34   ;;  %1143 = vst [vmem:[%s1399_s8 + $0x40] sm:$0xff] %v1099_v35  }
 0x102   : > { %v1197_v36 = vpop.f32.mrb[4].mxu0  ;;  %v1213_v37 = vpop.f32.mrb[4].mxu1 }
 0x103   : > { %v503_v38 = vpop.f32.mrb[5].mxu0  ;;  %v567_v39 = vpop.f32.mrb[5].mxu1 }
 0x104   : > { %v1198_v40 = vpop.f32.mrb[6].mxu0  ;;  %v1214_v41 = vpop.f32.mrb[6].mxu1 }
 0x105   : > { %v1074_v42 = vpack.c.bf16 %v1198_v40, %v1197_v36  ;;  %v1114_v43 = vpack.c.bf16 %v1214_v41, %v1213_v37  ;;  %v506_v44 = vpop.f32.mrb[7].mxu0  ;;  %v570_v45 = vpop.f32.mrb[7].mxu1 }
 0x106   : > { %v1069_v46 = vpack.c.bf16 %v506_v44, %v503_v38  ;;  %v1109_v47 = vpack.c.bf16 %v570_v45, %v567_v39 }
 0x107   : > { %1138 = vst [vmem:[%s1399_s8 + $0x18] sm:$0xff] %v1074_v42   ;;  %1146 = vst [vmem:[%s1399_s8 + $0x58] sm:$0xff] %v1114_v43  }
 0x108   : > { %1137 = vst [vmem:[%s1399_s8 + $0x10] sm:$0xff] %v1069_v46   ;;  %1145 = vst [vmem:[%s1399_s8 + $0x50] sm:$0xff] %v1109_v47  }
 0x10a   : > { %v1201_v48 = vpop.f32.mrb[8].mxu0  ;;  %v1217_v49 = vpop.f32.mrb[8].mxu1 }
 0x10b   : > { %v519_v50 = vpop.f32.mrb[9].mxu0  ;;  %v583_v51 = vpop.f32.mrb[9].mxu1 }
 0x10c   : > { %v1202_v52 = vpop.f32.mrb[10].mxu0  ;;  %v1218_v53 = vpop.f32.mrb[10].mxu1 }
 0x10d   : > { %v1084_v54 = vpack.c.bf16 %v1202_v52, %v1201_v48  ;;  %v1124_v55 = vpack.c.bf16 %v1218_v53, %v1217_v49  ;;  %v522_v56 = vpop.f32.mrb[11].mxu0  ;;  %v586_v57 = vpop.f32.mrb[11].mxu1 }
 0x10e   : > { %v1079_v58 = vpack.c.bf16 %v522_v56, %v519_v50  ;;  %v1119_v59 = vpack.c.bf16 %v586_v57, %v583_v51 }
 0x10f   : > { %1140 = vst [vmem:[%s1399_s8 + $0x28] sm:$0xff] %v1084_v54   ;;  %1148 = vst [vmem:[%s1399_s8 + $0x68] sm:$0xff] %v1124_v55  }
 0x110   : > { %1139 = vst [vmem:[%s1399_s8 + $0x20] sm:$0xff] %v1079_v58   ;;  %1147 = vst [vmem:[%s1399_s8 + $0x60] sm:$0xff] %v1119_v59  }
 0x112   : > { %v1205_v60 = vpop.f32.mrb[12].mxu0  ;;  %v1221_v61 = vpop.f32.mrb[12].mxu1 }
 0x113   : > { %v535_v62 = vpop.f32.mrb[13].mxu0  ;;  %v599_v63 = vpop.f32.mrb[13].mxu1 }
 0x114   : > { %v1206_v0 = vpop.f32.mrb[14].mxu0  ;;  %v1222_v1 = vpop.f32.mrb[14].mxu1 }
 0x115   : > { %v1094_v2 = vpack.c.bf16 %v1206_v0, %v1205_v60  ;;  %v1134_v3 = vpack.c.bf16 %v1222_v1, %v1221_v61  ;;  %v538_v4 = vpop.f32.mrb[15].mxu0  ;;  %v602_v5 = vpop.f32.mrb[15].mxu1 }
 0x116   : > { %v1089_v6 = vpack.c.bf16 %v538_v4, %v535_v62  ;;  %v1129_v7 = vpack.c.bf16 %v602_v5, %v599_v63 }
 0x117   : > { %1142 = vst [vmem:[%s1399_s8 + $0x38] sm:$0xff] %v1094_v2   ;;  %1150 = vst [vmem:[%s1399_s8 + $0x78] sm:$0xff] %v1134_v3  }
 0x118   : > { %1141 = vst [vmem:[%s1399_s8 + $0x30] sm:$0xff] %v1089_v6   ;;  %1149 = vst [vmem:[%s1399_s8 + $0x70] sm:$0xff] %v1129_v7  }
 0x119 PF: > { %s12_s11 = sadd.s32 1, %s1309_s11   ;;  %s1429_s9 = smov %s1305_s10 }
 0x11a   : > { %p9_p5 = scmp.ge.s32.totalorder %s12_s11, 4   ;;  %s1430_s10 = smov %s1432_s12 }
 0x11c   :  { %11 = sbr.rel (!%p9_p5) target bundleno = 2 (0x2), region = 69 }

// kernel: graph_convolution.3
= control target key start
LH: loop header
LB: loop body
LE: loop exit
PB: predicated region body
PF: predicated region fallthrough
CT: control target
= control target key end

     0   :  { %s1577_s12 = smov 0   ;;  %s1579_s13 = smov 0   ;;  %s1862_s0 = inlined_call_operand.vmem [shape: bf16[512,512], index: 0, kind: input, shape index: {}]   ;;  %s1863_s1 = inlined_call_operand.vmem [shape: bf16[512,128], index: 1, kind: input, shape index: {}]   ;;  %s1864_s2 = inlined_call_operand.vmem [shape: f32[1,128], index: 2, kind: input, shape index: {}]   ;;  %s1865_s3 = inlined_call_operand.vmem [shape: f32[512,128], index: 3, kind: output, shape index: {}]  }
   0x1   :  { %s1581_s14 = smov 0   ;;  %s1583_s15 = smov 0  }
   0x2   :  { %s1585_s16 = smov 0   ;;  %s1587_s17 = smov 0  }
   0x3   :  { %s1589_s18 = smov 0  }
   0x4 LB: > { %s22_s19 = sadd.s32 1, %s1546_s16  ;;  %s25_s20 = sadd.s32 1, %s1550_s17  ;;  %s1554_s18 = sphi %s1589_s18, %s13_s18   ;;  %s1550_s17 = sphi %s1587_s17, %s1871_s17   ;;  %s1546_s16 = sphi %s1585_s16, %s1870_s16   ;;  %s1542_s15 = sphi %s1583_s15, %s1869_s15   ;;  %s1538_s14 = sphi %s1581_s14, %s1868_s14   ;;  %s1534_s13 = sphi %s1579_s13, %s1867_s13   ;;  %s1530_s12 = sphi %s1577_s12, %s1866_s12  }
   0x5   : > { %p23_p0 = scmp.ge.s32.totalorder %s22_s19, 2  ;;  %p41_p1 = scmp.ne.s32.totalorder %s1534_s13, %s1530_s12 }
   0x6   : > { %p42_p2 = scmp.eq.s32.totalorder %s1554_s18, 0  ;;  %s34_s24 = sadd.s32 1, %s1534_s13 }
   0x7   : > { %s1873_s19 = smov (%p23_p0, %s22_s19), 0  ;;  %s1875_s20 = smov (!%p23_p0, %s25_s20), %s1550_s17 }
   0x8   : > { %p43_p3 = por %p42_p2, %p41_p1  ;;  %p27_p4 = scmp.ge.s32.totalorder %s1875_s20, 2 }
   0x9   : > { %s30_s21 = ssub.s32 %s1546_s16, %s1873_s19  ;;  %p1185_p6 = scmp.ge.s32.totalorder %s1554_s18, 4 }
   0xa   : > { %s1877_s20 = smov (%p27_p4, %s1875_s20), 0 }
   0xb   : > { %s29_s22 = ssub.s32 %s1550_s17, %s1877_s20  ;;  %143 = sbr.rel (%p1185_p6) target bundleno = 41 (0x29), region = 20 }
   0xc   : > { %s31_s23 = sor.u32 %s30_s21, %s29_s22 }
   0xd   : > { %p32_p5 = scmp.eq.s32.totalorder %s31_s23, 0 }
   0xf   : > { %s1628_s25 = scalar_select %p32_p5, %s1534_s13, %s34_s24  }
  0x12   : > { %146 = sbr.rel (!%p43_p3) target bundleno = 41 (0x29), region = 24  ;;  %s148_s26 = sand.u32 (%p43_p3), 1, %s1534_s13  }
  0x13   : > { %s1188_s27 = sshll.u32 (%p43_p3), %s1546_s16, 1  ;;  %s1186_s28 = sshll.u32 (%p43_p3), %s148_s26, 8 }
  0x14   : > { %s1250_s29 = sshll.u32 (%p43_p3), %s1550_s17, 7  ;;  %s1642_s8 = scalar_lea.vmem (%p43_p3), [#allocation3], %s1186_s28 }
  0x15   : > { %s154_s30 = sadd.s32 (%p43_p3), %s1250_s29, %s1188_s27 }
  0x16   : > { %s1190_s4 = sshll.u32 (%p43_p3), %s154_s30, 2 }
  0x17   : > { %s1637_s7 = scalar_lea.vmem (%p43_p3), %s1862_s0, %s1190_s4 }
  0x18   : > { %v246_v0 = vld [vmem:[%s1637_s7] sm:$0xff] (%p43_p3)  ;;  %v248_v1 = vld [vmem:[%s1637_s7 + $0x10] sm:$0xff] (%p43_p3) }
  0x19   : > { %v250_v2 = vld [vmem:[%s1637_s7 + $0x20] sm:$0xff]  ;;  %247 = vst [vmem:[%s1642_s8] sm:$0xff] %v246_v0  ;;  %249 = vst [vmem:[%s1642_s8 + $0x8] sm:$0xff] %v248_v1  ;;  %v252_v3 = vld [vmem:[%s1637_s7 + $0x30] sm:$0xff] }
  0x1a   : > { %251 = vst [vmem:[%s1642_s8 + $0x10] sm:$0xff] %v250_v2  ;;  %v254_v4 = vld [vmem:[%s1637_s7 + $0x40] sm:$0xff]  ;;  %v256_v5 = vld [vmem:[%s1637_s7 + $0x50] sm:$0xff]  ;;  %253 = vst [vmem:[%s1642_s8 + $0x18] sm:$0xff] %v252_v3 }
  0x1b   : > { %255 = vst [vmem:[%s1642_s8 + $0x20] sm:$0xff] %v254_v4  ;;  %257 = vst [vmem:[%s1642_s8 + $0x28] sm:$0xff] %v256_v5  ;;  %v258_v6 = vld [vmem:[%s1637_s7 + $0x60] sm:$0xff]  ;;  %v260_v7 = vld [vmem:[%s1637_s7 + $0x70] sm:$0xff] }
  0x1c   : > { %v262_v8 = vld [vmem:[%s1637_s7 + $0x80] sm:$0xff]  ;;  %259 = vst [vmem:[%s1642_s8 + $0x30] sm:$0xff] %v258_v6  ;;  %261 = vst [vmem:[%s1642_s8 + $0x38] sm:$0xff] %v260_v7  ;;  %v264_v9 = vld [vmem:[%s1637_s7 + $0x90] sm:$0xff] }
  0x1d   : > { %263 = vst [vmem:[%s1642_s8 + $0x40] sm:$0xff] %v262_v8  ;;  %v266_v10 = vld [vmem:[%s1637_s7 + $0xa0] sm:$0xff]  ;;  %v268_v11 = vld [vmem:[%s1637_s7 + $0xb0] sm:$0xff]  ;;  %265 = vst [vmem:[%s1642_s8 + $0x48] sm:$0xff] %v264_v9 }
  0x1e   : > { %267 = vst [vmem:[%s1642_s8 + $0x50] sm:$0xff] %v266_v10  ;;  %269 = vst [vmem:[%s1642_s8 + $0x58] sm:$0xff] %v268_v11  ;;  %v270_v12 = vld [vmem:[%s1637_s7 + $0xc0] sm:$0xff]  ;;  %v272_v13 = vld [vmem:[%s1637_s7 + $0xd0] sm:$0xff] }
  0x1f   : > { %v274_v14 = vld [vmem:[%s1637_s7 + $0xe0] sm:$0xff]  ;;  %271 = vst [vmem:[%s1642_s8 + $0x60] sm:$0xff] %v270_v12  ;;  %273 = vst [vmem:[%s1642_s8 + $0x68] sm:$0xff] %v272_v13  ;;  %v276_v15 = vld [vmem:[%s1637_s7 + $0xf0] sm:$0xff] }
  0x20   : > { %275 = vst [vmem:[%s1642_s8 + $0x70] sm:$0xff] %v274_v14  ;;  %v278_v16 = vld [vmem:[%s1637_s7 + $0x100] sm:$0xff]  ;;  %v280_v17 = vld [vmem:[%s1637_s7 + $0x110] sm:$0xff]  ;;  %277 = vst [vmem:[%s1642_s8 + $0x78] sm:$0xff] %v276_v15 }
  0x21   : > { %279 = vst [vmem:[%s1642_s8 + $0x80] sm:$0xff] %v278_v16  ;;  %281 = vst [vmem:[%s1642_s8 + $0x88] sm:$0xff] %v280_v17  ;;  %v282_v18 = vld [vmem:[%s1637_s7 + $0x120] sm:$0xff]  ;;  %v284_v19 = vld [vmem:[%s1637_s7 + $0x130] sm:$0xff] }
  0x22   : > { %v286_v20 = vld [vmem:[%s1637_s7 + $0x140] sm:$0xff]  ;;  %283 = vst [vmem:[%s1642_s8 + $0x90] sm:$0xff] %v282_v18  ;;  %285 = vst [vmem:[%s1642_s8 + $0x98] sm:$0xff] %v284_v19  ;;  %v288_v21 = vld [vmem:[%s1637_s7 + $0x150] sm:$0xff] }
  0x23   : > { %287 = vst [vmem:[%s1642_s8 + $0xa0] sm:$0xff] %v286_v20  ;;  %v290_v22 = vld [vmem:[%s1637_s7 + $0x160] sm:$0xff]  ;;  %v292_v23 = vld [vmem:[%s1637_s7 + $0x170] sm:$0xff]  ;;  %289 = vst [vmem:[%s1642_s8 + $0xa8] sm:$0xff] %v288_v21 }
  0x24   : > { %291 = vst [vmem:[%s1642_s8 + $0xb0] sm:$0xff] %v290_v22  ;;  %293 = vst [vmem:[%s1642_s8 + $0xb8] sm:$0xff] %v292_v23  ;;  %v294_v24 = vld [vmem:[%s1637_s7 + $0x180] sm:$0xff]  ;;  %v296_v25 = vld [vmem:[%s1637_s7 + $0x190] sm:$0xff] }
  0x25   : > { %v298_v26 = vld [vmem:[%s1637_s7 + $0x1a0] sm:$0xff]  ;;  %295 = vst [vmem:[%s1642_s8 + $0xc0] sm:$0xff] %v294_v24  ;;  %297 = vst [vmem:[%s1642_s8 + $0xc8] sm:$0xff] %v296_v25  ;;  %v300_v27 = vld [vmem:[%s1637_s7 + $0x1b0] sm:$0xff] }
  0x26   : > { %299 = vst [vmem:[%s1642_s8 + $0xd0] sm:$0xff] %v298_v26  ;;  %v302_v28 = vld [vmem:[%s1637_s7 + $0x1c0] sm:$0xff]  ;;  %v304_v29 = vld [vmem:[%s1637_s7 + $0x1d0] sm:$0xff]  ;;  %301 = vst [vmem:[%s1642_s8 + $0xd8] sm:$0xff] %v300_v27 }
  0x27   : > { %303 = vst [vmem:[%s1642_s8 + $0xe0] sm:$0xff] %v302_v28  ;;  %305 = vst [vmem:[%s1642_s8 + $0xe8] sm:$0xff] %v304_v29  ;;  %v306_v30 = vld [vmem:[%s1637_s7 + $0x1e0] sm:$0xff]  ;;  %v308_v31 = vld [vmem:[%s1637_s7 + $0x1f0] sm:$0xff] }
  0x28   : > { %307 = vst [vmem:[%s1642_s8 + $0xf0] sm:$0xff] %v306_v30  ;;  %309 = vst [vmem:[%s1642_s8 + $0xf8] sm:$0xff] %v308_v31 }
  0x29 PF: > { %p1191_p7 = scmp.ge.s32.totalorder %s1554_s18, 1  ;;  %p323_p8 = scmp.lt.s32.totalorder %s1554_s18, 5 }
  0x2b   : > { %p324_p9 = pnand %p1191_p7, %p323_p8 }
  0x2c   : > { %s330_s9 = sand.u32 (!%p324_p9), 1, %s1530_s12   ;;  %s1193_s10 = sshll.u32 (!%p324_p9), %s1538_s14, 5 }
  0x2d   : > { %327 = sbr.rel (%p324_p9) target bundleno = 390 (0x186), region = 66  ;;  %s1192_s11 = sshll.u32 (!%p324_p9), %s330_s9, 8 }
  0x2e   : > { %p361_p10 = scmp.lt.s32.totalorder (!%p324_p9), %s1193_s10, 63  ;;  %s1195_s21 = sshll.u32 (!%p324_p9), %s1542_s15, 5 }
  0x2f   : > { %p367_p11 = scmp.lt.s32.totalorder (!%p324_p9), %s1195_s21, 63  ;;  %s1720_s12 = scalar_lea.vmem (!%p324_p9), [#allocation3], %s1192_s11 }
  0x30   : > { %p1197_p12 = scmp.ne.s32.totalorder (!%p324_p9), %s1538_s14, 0 }
  0x34   : > { %s1879_s10 = smov (!%p361_p10, %s1193_s10), 63  ;;  %s1881_s21 = smov (!%p367_p11, %s1195_s21), 63 }
  0x35   : > { %s1194_s22 = sshll.u32 %s1879_s10, 2  ;;  %s1196_s27 = sshll.u32 %s1881_s21, 3  ;;  %v1556_v32 = vmov (!%p1197_p12), 0.0  }
  0x36   : > { %s1713_s26 = scalar_lea.vmem %s1863_s1, %s1194_s22  ;;  %s1718_s30 = scalar_lea.vmem %s1865_s3, %s1196_s27  ;;  %377 = vst [vmem:[#allocation2] sm:$0xff] (!%p1197_p12), %v1556_v32  ;;  %378 = vst [vmem:[#allocation2 + $0x8] sm:$0xff] (!%p1197_p12), %v1556_v32 }
  0x37   : > { %376 = sbr.rel (%p1197_p12) target bundleno = 70 (0x46), region = 74  ;;  %379 = vst [vmem:[#allocation2 + $0x10] sm:$0xff] (!%p1197_p12), %v1556_v32  ;;  %380 = vst [vmem:[#allocation2 + $0x18] sm:$0xff] (!%p1197_p12), %v1556_v32 }
  0x38   : > { %381 = vst [vmem:[#allocation2 + $0x20] sm:$0xff] (!%p1197_p12), %v1556_v32  ;;  %382 = vst [vmem:[#allocation2 + $0x28] sm:$0xff] (!%p1197_p12), %v1556_v32 }
  0x39   : > { %383 = vst [vmem:[#allocation2 + $0x30] sm:$0xff] (!%p1197_p12), %v1556_v32  ;;  %384 = vst [vmem:[#allocation2 + $0x38] sm:$0xff] (!%p1197_p12), %v1556_v32 }
  0x3a   : > { %385 = vst [vmem:[#allocation2 + $0x40] sm:$0xff] (!%p1197_p12), %v1556_v32  ;;  %386 = vst [vmem:[#allocation2 + $0x48] sm:$0xff] (!%p1197_p12), %v1556_v32 }
  0x3b   : > { %387 = vst [vmem:[#allocation2 + $0x50] sm:$0xff] (!%p1197_p12), %v1556_v32  ;;  %388 = vst [vmem:[#allocation2 + $0x58] sm:$0xff] (!%p1197_p12), %v1556_v32 }
  0x3c   : > { %389 = vst [vmem:[#allocation2 + $0x60] sm:$0xff] (!%p1197_p12), %v1556_v32  ;;  %390 = vst [vmem:[#allocation2 + $0x68] sm:$0xff] (!%p1197_p12), %v1556_v32 }
  0x3d   : > { %391 = vst [vmem:[#allocation2 + $0x70] sm:$0xff] (!%p1197_p12), %v1556_v32  ;;  %392 = vst [vmem:[#allocation2 + $0x78] sm:$0xff] (!%p1197_p12), %v1556_v32 }
  0x3e   : > { %393 = vst [vmem:[#allocation2 + $0x80] sm:$0xff] %v1556_v32  ;;  %394 = vst [vmem:[#allocation2 + $0x88] sm:$0xff] %v1556_v32 }
  0x3f   : > { %395 = vst [vmem:[#allocation2 + $0x90] sm:$0xff] %v1556_v32  ;;  %396 = vst [vmem:[#allocation2 + $0x98] sm:$0xff] %v1556_v32 }
  0x40   : > { %397 = vst [vmem:[#allocation2 + $0xa0] sm:$0xff] %v1556_v32  ;;  %398 = vst [vmem:[#allocation2 + $0xa8] sm:$0xff] %v1556_v32 }
  0x41   : > { %399 = vst [vmem:[#allocation2 + $0xb0] sm:$0xff] %v1556_v32  ;;  %400 = vst [vmem:[#allocation2 + $0xb8] sm:$0xff] %v1556_v32 }
  0x42   : > { %401 = vst [vmem:[#allocation2 + $0xc0] sm:$0xff] %v1556_v32  ;;  %402 = vst [vmem:[#allocation2 + $0xc8] sm:$0xff] %v1556_v32 }
  0x43   : > { %403 = vst [vmem:[#allocation2 + $0xd0] sm:$0xff] %v1556_v32  ;;  %404 = vst [vmem:[#allocation2 + $0xd8] sm:$0xff] %v1556_v32 }
  0x44   : > { %405 = vst [vmem:[#allocation2 + $0xe0] sm:$0xff] %v1556_v32  ;;  %406 = vst [vmem:[#allocation2 + $0xe8] sm:$0xff] %v1556_v32 }
  0x45   : > { %407 = vst [vmem:[#allocation2 + $0xf0] sm:$0xff] %v1556_v32  ;;  %408 = vst [vmem:[#allocation2 + $0xf8] sm:$0xff] %v1556_v32 }
  0x46 PF: > { %v1436_v33 = vld [vmem:[%s1713_s26 + $0x40] sm:$0xff]   ;;  %v1438_v35 = vld [vmem:[%s1713_s26 + $0x48] sm:$0xff]   ;;  %v1440_v37 = vld [vmem:[%s1713_s26 + $0x50] sm:$0xff]   ;;  %p1246_p13 = scmp.ne.s32.totalorder %s1538_s14, 1 }
  0x47   : > { %v1437_v34 = vld [vmem:[%s1713_s26] sm:$0xff]   ;;  %1251 = vmatprep.subr.bf16.mxu0 %v1436_v33  ;;  %1363 = vmatprep.subr.bf16.mxu1 %v1436_v33  ;;  %v1439_v36 = vld [vmem:[%s1713_s26 + $0x8] sm:$0xff]   ;;  %v1441_v38 = vld [vmem:[%s1713_s26 + $0x10] sm:$0xff]  }
  0x48   : > { %1252 = vmatpush3.bf16.msra.mxu0 %v1437_v34  ;;  %1371 = vmatpush3.bf16.msra.mxu1 %v1437_v34  ;;  %v1442_v39 = vld [vmem:[%s1713_s26 + $0x58] sm:$0xff]   ;;  %v1444_v41 = vld [vmem:[%s1713_s26 + $0x60] sm:$0xff]   ;;  %v1446_v43 = vld [vmem:[%s1713_s26 + $0x68] sm:$0xff]  }
  0x49   : > { %1253 = vmatprep.subr.bf16.mxu0 %v1438_v35  ;;  %1364 = vmatprep.subr.bf16.mxu1 %v1438_v35  ;;  %v1443_v40 = vld [vmem:[%s1713_s26 + $0x18] sm:$0xff]   ;;  %v1445_v42 = vld [vmem:[%s1713_s26 + $0x20] sm:$0xff]   ;;  %v1447_v46 = vld [vmem:[%s1713_s26 + $0x28] sm:$0xff]  }
  0x4a   : > { %v1454_v44 = vld [vmem:[%s1720_s12 + $0x4] ss:$8 sps:$4 sm:$0xff]   ;;  %v1448_v47 = vld [vmem:[%s1713_s26 + $0x70] sm:$0xff]   ;;  %v1450_v49 = vld [vmem:[%s1713_s26 + $0x78] sm:$0xff]  }
  0x4b   : > { %v1457_v45 = vld [vmem:[%s1720_s12 + $0x84] ss:$8 sps:$4 sm:$0xff]   ;;  %793 = vmatprep.mubr.bf16.mxu0 %v1454_v44  ;;  %v1449_v48 = vld [vmem:[%s1713_s26 + $0x30] sm:$0xff]   ;;  %v1451_v50 = vld [vmem:[%s1713_s26 + $0x38] sm:$0xff]  }
  0x4c   : > { %1254 = vmatpush3.bf16.msra.mxu0 %v1439_v36  ;;  %1372 = vmatpush3.bf16.msra.mxu1 %v1439_v36  ;;  %v1452_v51 = vld [vmem:[%s1720_s12] ss:$8 sps:$4 sm:$0xff]   ;;  %v1458_v53 = vld [vmem:[%s1720_s12 + $0x14] ss:$8 sps:$4 sm:$0xff]   ;;  %v1462_v55 = vld [vmem:[%s1720_s12 + $0x10] ss:$8 sps:$4 sm:$0xff]  }
  0x4d   : > { %1255 = vmatprep.subr.bf16.mxu0 %v1440_v37  ;;  %1365 = vmatprep.subr.bf16.mxu1 %v1440_v37  ;;  %v1455_v52 = vld [vmem:[%s1720_s12 + $0x80] ss:$8 sps:$4 sm:$0xff]   ;;  %v1460_v54 = vld [vmem:[%s1720_s12 + $0x94] ss:$8 sps:$4 sm:$0xff]   ;;  %v1463_v56 = vld [vmem:[%s1720_s12 + $0x90] ss:$8 sps:$4 sm:$0xff]  }
  0x4e   : > { %857 = vmatprep.mubr.bf16.mxu1 %v1457_v45  ;;  %v1464_v57 = vld [vmem:[%s1720_s12 + $0x24] ss:$8 sps:$4 sm:$0xff]   ;;  %v1468_v59 = vld [vmem:[%s1720_s12 + $0x20] ss:$8 sps:$4 sm:$0xff]   ;;  %v1470_v61 = vld [vmem:[%s1720_s12 + $0x34] ss:$8 sps:$4 sm:$0xff]  }
  0x4f   : > { %v1466_v58 = vld [vmem:[%s1720_s12 + $0xa4] ss:$8 sps:$4 sm:$0xff]   ;;  %v1469_v60 = vld [vmem:[%s1720_s12 + $0xa0] ss:$8 sps:$4 sm:$0xff]   ;;  %v1472_v62 = vld [vmem:[%s1720_s12 + $0xb4] ss:$8 sps:$4 sm:$0xff]  }
  0x50   : > { %1256 = vmatpush3.bf16.msra.mxu0 %v1441_v38  ;;  %1373 = vmatpush3.bf16.msra.mxu1 %v1441_v38  ;;  %v1474_v63 = vld [vmem:[%s1720_s12 + $0x30] ss:$8 sps:$4 sm:$0xff]   ;;  %v1476_v1 = vld [vmem:[%s1720_s12 + $0x44] ss:$8 sps:$4 sm:$0xff]   ;;  %v1480_v3 = vld [vmem:[%s1720_s12 + $0x40] ss:$8 sps:$4 sm:$0xff]  }
  0x51   : > { %1257 = vmatprep.subr.bf16.mxu0 %v1442_v39  ;;  %1366 = vmatprep.subr.bf16.mxu1 %v1442_v39  ;;  %v1475_v0 = vld [vmem:[%s1720_s12 + $0xb0] ss:$8 sps:$4 sm:$0xff]   ;;  %v1478_v2 = vld [vmem:[%s1720_s12 + $0xc4] ss:$8 sps:$4 sm:$0xff]   ;;  %v1481_v4 = vld [vmem:[%s1720_s12 + $0xc0] ss:$8 sps:$4 sm:$0xff]  }
  0x52   : > { %v1482_v5 = vld [vmem:[%s1720_s12 + $0x54] ss:$8 sps:$4 sm:$0xff]   ;;  %v1486_v7 = vld [vmem:[%s1720_s12 + $0x50] ss:$8 sps:$4 sm:$0xff]   ;;  %v1488_v9 = vld [vmem:[%s1720_s12 + $0x64] ss:$8 sps:$4 sm:$0xff]  }
  0x53   : > { %v1484_v6 = vld [vmem:[%s1720_s12 + $0xd4] ss:$8 sps:$4 sm:$0xff]   ;;  %v1487_v8 = vld [vmem:[%s1720_s12 + $0xd0] ss:$8 sps:$4 sm:$0xff]   ;;  %v1490_v10 = vld [vmem:[%s1720_s12 + $0xe4] ss:$8 sps:$4 sm:$0xff]  }
  0x54   : > { %1258 = vmatpush3.bf16.msra.mxu0 %v1443_v40  ;;  %1374 = vmatpush3.bf16.msra.mxu1 %v1443_v40  ;;  %v1492_v11 = vld [vmem:[%s1720_s12 + $0x60] ss:$8 sps:$4 sm:$0xff]   ;;  %v1494_v13 = vld [vmem:[%s1720_s12 + $0x74] ss:$8 sps:$4 sm:$0xff]   ;;  %v1498_v15 = vld [vmem:[%s1720_s12 + $0x70] ss:$8 sps:$4 sm:$0xff]  }
  0x55   : > { %1259 = vmatprep.subr.bf16.mxu0 %v1444_v41  ;;  %1367 = vmatprep.subr.bf16.mxu1 %v1444_v41  ;;  %v1493_v12 = vld [vmem:[%s1720_s12 + $0xe0] ss:$8 sps:$4 sm:$0xff]   ;;  %v1496_v14 = vld [vmem:[%s1720_s12 + $0xf4] ss:$8 sps:$4 sm:$0xff]   ;;  %v1499_v16 = vld [vmem:[%s1720_s12 + $0xf0] ss:$8 sps:$4 sm:$0xff]  }
  0x56   : > { %v409_v19 = vld [vmem:[#allocation2] sm:$0xff]  ;;  %v410_v27 = vld [vmem:[#allocation2 + $0x8] sm:$0xff]  ;;  %v411_v39 = vld [vmem:[#allocation2 + $0x10] sm:$0xff] }
  0x57   : > { %v425_v21 = vld [vmem:[#allocation2 + $0x80] sm:$0xff]  ;;  %v426_v29 = vld [vmem:[#allocation2 + $0x88] sm:$0xff]  ;;  %v427_v41 = vld [vmem:[#allocation2 + $0x90] sm:$0xff] }
  0x58   : > { %1260 = vmatpush3.bf16.msra.mxu0 %v1445_v42  ;;  %1375 = vmatpush3.bf16.msra.mxu1 %v1445_v42 }
  0x59   : > { %1261 = vmatprep.subr.bf16.mxu0 %v1446_v43  ;;  %1368 = vmatprep.subr.bf16.mxu1 %v1446_v43 }
  0x5c   : > { %1262 = vmatpush3.bf16.msra.mxu0 %v1447_v46  ;;  %1376 = vmatpush3.bf16.msra.mxu1 %v1447_v46 }
  0x5d   : > { %1263 = vmatprep.subr.bf16.mxu0 %v1448_v47  ;;  %1369 = vmatprep.subr.bf16.mxu1 %v1448_v47  ;;  %v412_v47 = vld [vmem:[#allocation2 + $0x18] sm:$0xff] }
  0x60   : > { %1264 = vmatpush3.bf16.msra.mxu0 %v1449_v48  ;;  %1377 = vmatpush3.bf16.msra.mxu1 %v1449_v48 }
  0x61   : > { %1265 = vmatprep.subr.bf16.mxu0 %v1450_v49  ;;  %1370 = vmatprep.subr.bf16.mxu1 %v1450_v49  ;;  %v428_v49 = vld [vmem:[#allocation2 + $0x98] sm:$0xff] }
  0x64   : > { %1266 = vmatpush3.bf16.msra.mxu0 %v1451_v50  ;;  %1378 = vmatpush3.bf16.msra.mxu1 %v1451_v50 }
  0x67   : > { %794 = vmatmul.mubr.bf16.vlgmr.msra.gmra.mrb[0].mxu0 %v1452_v51  ;;  %858 = vmatmul.mubr.bf16.vlgmr.msra.gmra.mrb[0].mxu1 %v1455_v52 }
  0x68   : > { %801 = vmatprep.mubr.bf16.mxu0 %v1458_v53  ;;  %865 = vmatprep.mubr.bf16.mxu1 %v1460_v54 }
  0x6f   : > { %802 = vmatmul.mubr.bf16.gmra.mrb[4].mxu0 %v1462_v55  ;;  %866 = vmatmul.mubr.bf16.gmra.mrb[4].mxu1 %v1463_v56 }
  0x70   : > { %809 = vmatprep.mubr.bf16.mxu0 %v1464_v57  ;;  %873 = vmatprep.mubr.bf16.mxu1 %v1466_v58 }
  0x77   : > { %810 = vmatmul.mubr.bf16.gmra.mrb[8].mxu0 %v1468_v59  ;;  %874 = vmatmul.mubr.bf16.gmra.mrb[8].mxu1 %v1469_v60  ;;  %v413_v59 = vld [vmem:[#allocation2 + $0x20] sm:$0xff] }
  0x78   : > { %817 = vmatprep.mubr.bf16.mxu0 %v1470_v61  ;;  %881 = vmatprep.mubr.bf16.mxu1 %v1472_v62  ;;  %v429_v61 = vld [vmem:[#allocation2 + $0xa0] sm:$0xff] }
  0x7f   : > { %818 = vmatmul.mubr.bf16.gmra.mrb[12].mxu0 %v1474_v63  ;;  %882 = vmatmul.mubr.bf16.gmra.mrb[12].mxu1 %v1475_v0 }
  0x80   : > { %825 = vmatprep.mubr.bf16.mxu0 %v1476_v1  ;;  %889 = vmatprep.mubr.bf16.mxu1 %v1478_v2 }
  0x87   : > { %826 = vmatmul.mubr.bf16.gmra.mrb[16].mxu0 %v1480_v3  ;;  %890 = vmatmul.mubr.bf16.gmra.mrb[16].mxu1 %v1481_v4  ;;  %v414_v3 = vld [vmem:[#allocation2 + $0x28] sm:$0xff] }
  0x88   : > { %833 = vmatprep.mubr.bf16.mxu0 %v1482_v5  ;;  %897 = vmatprep.mubr.bf16.mxu1 %v1484_v6  ;;  %v430_v5 = vld [vmem:[#allocation2 + $0xa8] sm:$0xff] }
  0x8f   : > { %834 = vmatmul.mubr.bf16.gmra.mrb[20].mxu0 %v1486_v7  ;;  %898 = vmatmul.mubr.bf16.gmra.mrb[20].mxu1 %v1487_v8 }
  0x90   : > { %841 = vmatprep.mubr.bf16.mxu0 %v1488_v9  ;;  %905 = vmatprep.mubr.bf16.mxu1 %v1490_v10 }
  0x97   : > { %842 = vmatmul.mubr.bf16.gmra.mrb[24].mxu0 %v1492_v11  ;;  %906 = vmatmul.mubr.bf16.gmra.mrb[24].mxu1 %v1493_v12 }
  0x98   : > { %849 = vmatprep.mubr.bf16.mxu0 %v1494_v13  ;;  %913 = vmatprep.mubr.bf16.mxu1 %v1496_v14 }
  0x9f   : > { %850 = vmatmul.mubr.bf16.gmra.mrb[28].mxu0 %v1498_v15  ;;  %914 = vmatmul.mubr.bf16.gmra.mrb[28].mxu1 %v1499_v16  ;;  %v415_v15 = vld [vmem:[#allocation2 + $0x30] sm:$0xff] }
 0x13a   : > { %v1267_v17 = vpop.f32.mrb[0].mxu0  ;;  %v1315_v18 = vpop.f32.mrb[0].mxu1 }
 0x13b   : > { %v1268_v20 = vpop.f32.mrb[1].mxu0  ;;  %v1316_v22 = vpop.f32.mrb[1].mxu1 }
 0x13c   : > { %v1269_v23 = vadd.f32 %v1268_v20, %v1267_v17  ;;  %v1317_v24 = vadd.f32 %v1316_v22, %v1315_v18  ;;  %v1270_v25 = vpop.f32.mrb[2].mxu0  ;;  %v1318_v26 = vpop.f32.mrb[2].mxu1  ;;  %v431_v17 = vld [vmem:[#allocation2 + $0xb0] sm:$0xff] }
 0x13d   : > { %v1271_v28 = vpop.f32.mrb[3].mxu0  ;;  %v1319_v30 = vpop.f32.mrb[3].mxu1 }
 0x13e   : > { %v922_v31 = vadd.f32 %v1269_v23, %v409_v19  ;;  %v938_v32 = vadd.f32 %v1317_v24, %v425_v21  ;;  %v1272_v33 = vadd.f32 %v1271_v28, %v1270_v25  ;;  %v1320_v34 = vadd.f32 %v1319_v30, %v1318_v26  ;;  %v416_v23 = vld [vmem:[#allocation2 + $0x38] sm:$0xff] }
 0x13f   : > { %v432_v25 = vld [vmem:[#allocation2 + $0xb8] sm:$0xff] }
 0x140   : > { %954 = vst [vmem:[#allocation2] sm:$0xff] %v922_v31  ;;  %970 = vst [vmem:[#allocation2 + $0x80] sm:$0xff] %v938_v32  ;;  %v923_v35 = vadd.f32 %v1272_v33, %v410_v27  ;;  %v939_v36 = vadd.f32 %v1320_v34, %v426_v29 }
 0x142   : > { %955 = vst [vmem:[#allocation2 + $0x8] sm:$0xff] %v923_v35  ;;  %971 = vst [vmem:[#allocation2 + $0x88] sm:$0xff] %v939_v36  ;;  %v1273_v37 = vpop.f32.mrb[4].mxu0  ;;  %v1321_v38 = vpop.f32.mrb[4].mxu1  ;;  %v417_v35 = vld [vmem:[#allocation2 + $0x40] sm:$0xff] }
 0x143   : > { %v1274_v40 = vpop.f32.mrb[5].mxu0  ;;  %v1322_v42 = vpop.f32.mrb[5].mxu1 }
 0x144   : > { %v1275_v43 = vadd.f32 %v1274_v40, %v1273_v37  ;;  %v1323_v44 = vadd.f32 %v1322_v42, %v1321_v38  ;;  %v1276_v45 = vpop.f32.mrb[6].mxu0  ;;  %v1324_v46 = vpop.f32.mrb[6].mxu1  ;;  %v433_v37 = vld [vmem:[#allocation2 + $0xc0] sm:$0xff] }
 0x145   : > { %v1277_v48 = vpop.f32.mrb[7].mxu0  ;;  %v1325_v50 = vpop.f32.mrb[7].mxu1 }
 0x146   : > { %v924_v51 = vadd.f32 %v1275_v43, %v411_v39  ;;  %v940_v52 = vadd.f32 %v1323_v44, %v427_v41  ;;  %v1278_v53 = vadd.f32 %v1277_v48, %v1276_v45  ;;  %v1326_v54 = vadd.f32 %v1325_v50, %v1324_v46  ;;  %v418_v43 = vld [vmem:[#allocation2 + $0x48] sm:$0xff] }
 0x147   : > { %v434_v45 = vld [vmem:[#allocation2 + $0xc8] sm:$0xff] }
 0x148   : > { %956 = vst [vmem:[#allocation2 + $0x10] sm:$0xff] %v924_v51  ;;  %972 = vst [vmem:[#allocation2 + $0x90] sm:$0xff] %v940_v52  ;;  %v925_v55 = vadd.f32 %v1278_v53, %v412_v47  ;;  %v941_v56 = vadd.f32 %v1326_v54, %v428_v49 }
 0x14a   : > { %957 = vst [vmem:[#allocation2 + $0x18] sm:$0xff] %v925_v55  ;;  %973 = vst [vmem:[#allocation2 + $0x98] sm:$0xff] %v941_v56  ;;  %v1279_v57 = vpop.f32.mrb[8].mxu0  ;;  %v1327_v58 = vpop.f32.mrb[8].mxu1  ;;  %v419_v55 = vld [vmem:[#allocation2 + $0x50] sm:$0xff] }
 0x14b   : > { %v1280_v60 = vpop.f32.mrb[9].mxu0  ;;  %v1328_v62 = vpop.f32.mrb[9].mxu1 }
 0x14c   : > { %v1281_v63 = vadd.f32 %v1280_v60, %v1279_v57  ;;  %v1329_v0 = vadd.f32 %v1328_v62, %v1327_v58  ;;  %v1282_v1 = vpop.f32.mrb[10].mxu0  ;;  %v1330_v2 = vpop.f32.mrb[10].mxu1  ;;  %v435_v57 = vld [vmem:[#allocation2 + $0xd0] sm:$0xff] }
 0x14d   : > { %v1283_v4 = vpop.f32.mrb[11].mxu0  ;;  %v1331_v6 = vpop.f32.mrb[11].mxu1 }
 0x14e   : > { %v926_v7 = vadd.f32 %v1281_v63, %v413_v59  ;;  %v942_v8 = vadd.f32 %v1329_v0, %v429_v61  ;;  %v1284_v9 = vadd.f32 %v1283_v4, %v1282_v1  ;;  %v1332_v10 = vadd.f32 %v1331_v6, %v1330_v2  ;;  %v420_v63 = vld [vmem:[#allocation2 + $0x58] sm:$0xff] }
 0x14f   : > { %v436_v1 = vld [vmem:[#allocation2 + $0xd8] sm:$0xff] }
 0x150   : > { %958 = vst [vmem:[#allocation2 + $0x20] sm:$0xff] %v926_v7  ;;  %974 = vst [vmem:[#allocation2 + $0xa0] sm:$0xff] %v942_v8  ;;  %v927_v11 = vadd.f32 %v1284_v9, %v414_v3  ;;  %v943_v12 = vadd.f32 %v1332_v10, %v430_v5 }
 0x152   : > { %959 = vst [vmem:[#allocation2 + $0x28] sm:$0xff] %v927_v11  ;;  %975 = vst [vmem:[#allocation2 + $0xa8] sm:$0xff] %v943_v12  ;;  %v1285_v13 = vpop.f32.mrb[12].mxu0  ;;  %v1333_v14 = vpop.f32.mrb[12].mxu1  ;;  %v421_v11 = vld [vmem:[#allocation2 + $0x60] sm:$0xff] }
 0x153   : > { %v1286_v16 = vpop.f32.mrb[13].mxu0  ;;  %v1334_v18 = vpop.f32.mrb[13].mxu1 }
 0x154   : > { %v1287_v19 = vadd.f32 %v1286_v16, %v1285_v13  ;;  %v1335_v20 = vadd.f32 %v1334_v18, %v1333_v14  ;;  %v1288_v21 = vpop.f32.mrb[14].mxu0  ;;  %v1336_v22 = vpop.f32.mrb[14].mxu1  ;;  %v437_v13 = vld [vmem:[#allocation2 + $0xe0] sm:$0xff] }
 0x155   : > { %v1289_v24 = vpop.f32.mrb[15].mxu0  ;;  %v1337_v26 = vpop.f32.mrb[15].mxu1 }
 0x156   : > { %v928_v27 = vadd.f32 %v1287_v19, %v415_v15  ;;  %v944_v28 = vadd.f32 %v1335_v20, %v431_v17  ;;  %v1290_v29 = vadd.f32 %v1289_v24, %v1288_v21  ;;  %v1338_v30 = vadd.f32 %v1337_v26, %v1336_v22  ;;  %v422_v19 = vld [vmem:[#allocation2 + $0x68] sm:$0xff] }
 0x157   : > { %v438_v21 = vld [vmem:[#allocation2 + $0xe8] sm:$0xff] }
 0x158   : > { %960 = vst [vmem:[#allocation2 + $0x30] sm:$0xff] %v928_v27  ;;  %976 = vst [vmem:[#allocation2 + $0xb0] sm:$0xff] %v944_v28  ;;  %v929_v31 = vadd.f32 %v1290_v29, %v416_v23  ;;  %v945_v32 = vadd.f32 %v1338_v30, %v432_v25 }
 0x15a   : > { %961 = vst [vmem:[#allocation2 + $0x38] sm:$0xff] %v929_v31  ;;  %977 = vst [vmem:[#allocation2 + $0xb8] sm:$0xff] %v945_v32  ;;  %v1291_v33 = vpop.f32.mrb[16].mxu0  ;;  %v1339_v34 = vpop.f32.mrb[16].mxu1  ;;  %v423_v31 = vld [vmem:[#allocation2 + $0x70] sm:$0xff] }
 0x15b   : > { %v1292_v36 = vpop.f32.mrb[17].mxu0  ;;  %v1340_v38 = vpop.f32.mrb[17].mxu1 }
 0x15c   : > { %v1293_v39 = vadd.f32 %v1292_v36, %v1291_v33  ;;  %v1341_v40 = vadd.f32 %v1340_v38, %v1339_v34  ;;  %v1294_v41 = vpop.f32.mrb[18].mxu0  ;;  %v1342_v42 = vpop.f32.mrb[18].mxu1  ;;  %v439_v33 = vld [vmem:[#allocation2 + $0xf0] sm:$0xff] }
 0x15d   : > { %v1295_v44 = vpop.f32.mrb[19].mxu0  ;;  %v1343_v46 = vpop.f32.mrb[19].mxu1 }
 0x15e   : > { %v930_v47 = vadd.f32 %v1293_v39, %v417_v35  ;;  %v946_v48 = vadd.f32 %v1341_v40, %v433_v37  ;;  %v1296_v49 = vadd.f32 %v1295_v44, %v1294_v41  ;;  %v1344_v50 = vadd.f32 %v1343_v46, %v1342_v42  ;;  %v424_v39 = vld [vmem:[#allocation2 + $0x78] sm:$0xff] }
 0x15f   : > { %v440_v41 = vld [vmem:[#allocation2 + $0xf8] sm:$0xff] }
 0x160   : > { %962 = vst [vmem:[#allocation2 + $0x40] sm:$0xff] %v930_v47  ;;  %978 = vst [vmem:[#allocation2 + $0xc0] sm:$0xff] %v946_v48  ;;  %v931_v51 = vadd.f32 %v1296_v49, %v418_v43  ;;  %v947_v52 = vadd.f32 %v1344_v50, %v434_v45  ;;  %v990_v49 = vld [vmem:[#allocation2] sm:$0xff] (!%p1246_p13) }
 0x161   : > { %v1775_v50 = vld [vmem:[%s1864_s2] ss:$0 sm:$0xff] (!%p1246_p13) }
 0x162   : > { %963 = vst [vmem:[#allocation2 + $0x48] sm:$0xff] %v931_v51  ;;  %979 = vst [vmem:[#allocation2 + $0xc8] sm:$0xff] %v947_v52  ;;  %v1297_v53 = vpop.f32.mrb[20].mxu0  ;;  %v1345_v54 = vpop.f32.mrb[20].mxu1  ;;  %v991_v51 = vld [vmem:[#allocation2 + $0x8] sm:$0xff] (!%p1246_p13)  ;;  %v1029_v52 = vadd.f32 (!%p1246_p13), %v1775_v50, %v990_v49 }
 0x163   : > { %v1298_v56 = vpop.f32.mrb[21].mxu0  ;;  %v1346_v58 = vpop.f32.mrb[21].mxu1 }
 0x164   : > { %v1299_v59 = vadd.f32 %v1298_v56, %v1297_v53  ;;  %v1347_v60 = vadd.f32 %v1346_v58, %v1345_v54  ;;  %v1300_v61 = vpop.f32.mrb[22].mxu0  ;;  %v1348_v62 = vpop.f32.mrb[22].mxu1  ;;  %v1030_v53 = vadd.f32 (!%p1246_p13), %v1775_v50, %v991_v51  ;;  %v992_v54 = vld [vmem:[#allocation2 + $0x10] sm:$0xff] (!%p1246_p13)  ;;  %v994_v56 = vld [vmem:[#allocation2 + $0x20] sm:$0xff] (!%p1246_p13)  ;;  %1061 = vst [vmem:[%s1718_s30] sm:$0xff] (!%p1246_p13), %v1029_v52 }
 0x165   : > { %v1301_v0 = vpop.f32.mrb[23].mxu0  ;;  %v1349_v2 = vpop.f32.mrb[23].mxu1 }
 0x166   : > { %v932_v3 = vadd.f32 %v1299_v59, %v419_v55  ;;  %v948_v4 = vadd.f32 %v1347_v60, %v435_v57  ;;  %v1302_v5 = vadd.f32 %v1301_v0, %v1300_v61  ;;  %v1350_v6 = vadd.f32 %v1349_v2, %v1348_v62  ;;  %v993_v55 = vld [vmem:[#allocation2 + $0x18] sm:$0xff] (!%p1246_p13)  ;;  %v995_v60 = vld [vmem:[#allocation2 + $0x28] sm:$0xff] (!%p1246_p13)  ;;  %v996_v61 = vld [vmem:[#allocation2 + $0x30] sm:$0xff] (!%p1246_p13)  ;;  %1062 = vst [vmem:[%s1718_s30 + $0x8] sm:$0xff] (!%p1246_p13), %v1030_v53 }
 0x167   : > { %v1031_v57 = vadd.f32 (!%p1246_p13), %v1775_v50, %v992_v54  ;;  %v1032_v58 = vadd.f32 (!%p1246_p13), %v1775_v50, %v993_v55  ;;  %v1033_v59 = vadd.f32 (!%p1246_p13), %v1775_v50, %v994_v56  ;;  %v997_v62 = vld [vmem:[#allocation2 + $0x38] sm:$0xff] (!%p1246_p13)  ;;  %v1035_v0 = vadd.f32 (!%p1246_p13), %v1775_v50, %v996_v61  ;;  %v998_v2 = vld [vmem:[#allocation2 + $0x40] sm:$0xff] (!%p1246_p13) }
 0x168   : > { %964 = vst [vmem:[#allocation2 + $0x50] sm:$0xff] %v932_v3  ;;  %980 = vst [vmem:[#allocation2 + $0xd0] sm:$0xff] %v948_v4  ;;  %v933_v7 = vadd.f32 %v1302_v5, %v420_v63  ;;  %v949_v8 = vadd.f32 %v1350_v6, %v436_v1  ;;  %v1034_v63 = vadd.f32 (!%p1246_p13), %v1775_v50, %v995_v60 }
 0x169   : > { %v1036_v1 = vadd.f32 (!%p1246_p13), %v1775_v50, %v997_v62  ;;  %v999_v3 = vld [vmem:[#allocation2 + $0x48] sm:$0xff] (!%p1246_p13)  ;;  %1063 = vst [vmem:[%s1718_s30 + $0x10] sm:$0xff] (!%p1246_p13), %v1031_v57  ;;  %1064 = vst [vmem:[%s1718_s30 + $0x18] sm:$0xff] (!%p1246_p13), %v1032_v58  ;;  %v1037_v5 = vadd.f32 (!%p1246_p13), %v1775_v50, %v998_v2 }
 0x16a   : > { %965 = vst [vmem:[#allocation2 + $0x58] sm:$0xff] %v933_v7  ;;  %981 = vst [vmem:[#allocation2 + $0xd8] sm:$0xff] %v949_v8  ;;  %v1303_v9 = vpop.f32.mrb[24].mxu0  ;;  %v1351_v10 = vpop.f32.mrb[24].mxu1  ;;  %v1038_v6 = vadd.f32 (!%p1246_p13), %v1775_v50, %v999_v3 }
 0x16b   : > { %v1304_v12 = vpop.f32.mrb[25].mxu0  ;;  %v1352_v14 = vpop.f32.mrb[25].mxu1  ;;  %1065 = vst [vmem:[%s1718_s30 + $0x20] sm:$0xff] (!%p1246_p13), %v1033_v59  ;;  %1066 = vst [vmem:[%s1718_s30 + $0x28] sm:$0xff] (!%p1246_p13), %v1034_v63 }
 0x16c   : > { %v1305_v15 = vadd.f32 %v1304_v12, %v1303_v9  ;;  %v1353_v16 = vadd.f32 %v1352_v14, %v1351_v10  ;;  %v1306_v17 = vpop.f32.mrb[26].mxu0  ;;  %v1354_v18 = vpop.f32.mrb[26].mxu1  ;;  %1067 = vst [vmem:[%s1718_s30 + $0x30] sm:$0xff] (!%p1246_p13), %v1035_v0  ;;  %1068 = vst [vmem:[%s1718_s30 + $0x38] sm:$0xff] (!%p1246_p13), %v1036_v1 }
 0x16d   : > { %v1307_v20 = vpop.f32.mrb[27].mxu0  ;;  %v1355_v22 = vpop.f32.mrb[27].mxu1  ;;  %1069 = vst [vmem:[%s1718_s30 + $0x40] sm:$0xff] (!%p1246_p13), %v1037_v5  ;;  %1070 = vst [vmem:[%s1718_s30 + $0x48] sm:$0xff] (!%p1246_p13), %v1038_v6 }
 0x16e   : > { %v934_v23 = vadd.f32 %v1305_v15, %v421_v11  ;;  %v950_v24 = vadd.f32 %v1353_v16, %v437_v13  ;;  %v1308_v25 = vadd.f32 %v1307_v20, %v1306_v17  ;;  %v1356_v26 = vadd.f32 %v1355_v22, %v1354_v18  ;;  %v1006_v16 = vld [vmem:[#allocation2 + $0x80] sm:$0xff] (!%p1246_p13)  ;;  %v1007_v20 = vld [vmem:[#allocation2 + $0x88] sm:$0xff] (!%p1246_p13)  ;;  %v1009_v22 = vld [vmem:[#allocation2 + $0x98] sm:$0xff] (!%p1246_p13) }
 0x16f   : > { %v1000_v4 = vld [vmem:[#allocation2 + $0x50] sm:$0xff] (!%p1246_p13) }
 0x170   : > { %966 = vst [vmem:[#allocation2 + $0x60] sm:$0xff] %v934_v23  ;;  %982 = vst [vmem:[#allocation2 + $0xe0] sm:$0xff] %v950_v24  ;;  %v935_v27 = vadd.f32 %v1308_v25, %v422_v19  ;;  %v951_v28 = vadd.f32 %v1356_v26, %v438_v21  ;;  %v1039_v7 = vadd.f32 (!%p1246_p13), %v1775_v50, %v1000_v4  ;;  %v1008_v21 = vld [vmem:[#allocation2 + $0x90] sm:$0xff] (!%p1246_p13)  ;;  %v1010_v26 = vld [vmem:[#allocation2 + $0xa0] sm:$0xff] (!%p1246_p13) }
 0x171   : > { %v1001_v8 = vld [vmem:[#allocation2 + $0x58] sm:$0xff] (!%p1246_p13)  ;;  %v1045_v19 = vadd.f32 (!%p1246_p13), %v1775_v50, %v1006_v16  ;;  %v1046_v23 = vadd.f32 (!%p1246_p13), %v1775_v50, %v1007_v20  ;;  %v1047_v24 = vadd.f32 (!%p1246_p13), %v1775_v50, %v1008_v21  ;;  %v1048_v25 = vadd.f32 (!%p1246_p13), %v1775_v50, %v1009_v22 }
 0x172   : > { %967 = vst [vmem:[#allocation2 + $0x68] sm:$0xff] %v935_v27  ;;  %983 = vst [vmem:[#allocation2 + $0xe8] sm:$0xff] %v951_v28  ;;  %v1309_v29 = vpop.f32.mrb[28].mxu0  ;;  %v1357_v30 = vpop.f32.mrb[28].mxu1  ;;  %v1040_v11 = vadd.f32 (!%p1246_p13), %v1775_v50, %v1001_v8  ;;  %v1011_v27 = vld [vmem:[#allocation2 + $0xa8] sm:$0xff] (!%p1246_p13)  ;;  %v1012_v28 = vld [vmem:[#allocation2 + $0xb0] sm:$0xff] (!%p1246_p13) }
 0x173   : > { %v1310_v32 = vpop.f32.mrb[29].mxu0  ;;  %v1358_v34 = vpop.f32.mrb[29].mxu1  ;;  %1071 = vst [vmem:[%s1718_s30 + $0x50] sm:$0xff] (!%p1246_p13), %v1039_v7  ;;  %1077 = vst [vmem:[%s1718_s30 + $0x80] sm:$0xff] (!%p1246_p13), %v1045_v19 }
 0x174   : > { %v1311_v35 = vadd.f32 %v1310_v32, %v1309_v29  ;;  %v1359_v36 = vadd.f32 %v1358_v34, %v1357_v30  ;;  %v1312_v37 = vpop.f32.mrb[30].mxu0  ;;  %v1360_v38 = vpop.f32.mrb[30].mxu1  ;;  %989 = sbr.rel (%p1246_p13) target bundleno = 390 (0x186), region = 78  ;;  %1072 = vst [vmem:[%s1718_s30 + $0x58] sm:$0xff] (!%p1246_p13), %v1040_v11  ;;  %v1049_v29 = vadd.f32 (!%p1246_p13), %v1775_v50, %v1010_v26  ;;  %v1050_v30 = vadd.f32 (!%p1246_p13), %v1775_v50, %v1011_v27  ;;  %v1013_v32 = vld [vmem:[#allocation2 + $0xb8] sm:$0xff] (!%p1246_p13)  ;;  %v1015_v34 = vld [vmem:[#allocation2 + $0xc8] sm:$0xff] (!%p1246_p13) }
 0x175   : > { %v1313_v40 = vpop.f32.mrb[31].mxu0  ;;  %v1361_v42 = vpop.f32.mrb[31].mxu1  ;;  %1078 = vst [vmem:[%s1718_s30 + $0x88] sm:$0xff] (!%p1246_p13), %v1046_v23  ;;  %1079 = vst [vmem:[%s1718_s30 + $0x90] sm:$0xff] (!%p1246_p13), %v1047_v24 }
 0x176   : > { %v936_v43 = vadd.f32 %v1311_v35, %v423_v31  ;;  %v952_v44 = vadd.f32 %v1359_v36, %v439_v33  ;;  %v1314_v45 = vadd.f32 %v1313_v40, %v1312_v37  ;;  %v1362_v46 = vadd.f32 %v1361_v42, %v1360_v38  ;;  %v1014_v33 = vld [vmem:[#allocation2 + $0xc0] sm:$0xff] (!%p1246_p13)  ;;  %1080 = vst [vmem:[%s1718_s30 + $0x98] sm:$0xff] (!%p1246_p13), %v1048_v25  ;;  %v1016_v38 = vld [vmem:[#allocation2 + $0xd0] sm:$0xff] (!%p1246_p13) }
 0x177   : > { %v1002_v9 = vld [vmem:[#allocation2 + $0x60] sm:$0xff] (!%p1246_p13)  ;;  %v1051_v31 = vadd.f32 (!%p1246_p13), %v1775_v50, %v1012_v28  ;;  %v1052_v35 = vadd.f32 (!%p1246_p13), %v1775_v50, %v1013_v32  ;;  %v1053_v36 = vadd.f32 (!%p1246_p13), %v1775_v50, %v1014_v33  ;;  %v1054_v37 = vadd.f32 (!%p1246_p13), %v1775_v50, %v1015_v34  ;;  %1081 = vst [vmem:[%s1718_s30 + $0xa0] sm:$0xff] (!%p1246_p13), %v1049_v29 }
 0x178   : > { %968 = vst [vmem:[#allocation2 + $0x70] sm:$0xff] %v936_v43  ;;  %984 = vst [vmem:[#allocation2 + $0xf0] sm:$0xff] %v952_v44  ;;  %v937_v47 = vadd.f32 %v1314_v45, %v424_v39  ;;  %v953_v48 = vadd.f32 %v1362_v46, %v440_v41  ;;  %v1041_v12 = vadd.f32 (!%p1246_p13), %v1775_v50, %v1002_v9  ;;  %v1017_v39 = vld [vmem:[#allocation2 + $0xd8] sm:$0xff] (!%p1246_p13)  ;;  %v1018_v40 = vld [vmem:[#allocation2 + $0xe0] sm:$0xff] (!%p1246_p13) }
 0x179   : > { %v1003_v10 = vld [vmem:[#allocation2 + $0x68] sm:$0xff] (!%p1246_p13)  ;;  %1082 = vst [vmem:[%s1718_s30 + $0xa8] sm:$0xff] (!%p1246_p13), %v1050_v30  ;;  %1083 = vst [vmem:[%s1718_s30 + $0xb0] sm:$0xff] (!%p1246_p13), %v1051_v31  ;;  %v1055_v41 = vadd.f32 (!%p1246_p13), %v1775_v50, %v1016_v38  ;;  %v1056_v42 = vadd.f32 (!%p1246_p13), %v1775_v50, %v1017_v39  ;;  %v1057_v43 = vadd.f32 (!%p1246_p13), %v1775_v50, %v1018_v40 }
 0x17a   : > { %969 = vst [vmem:[#allocation2 + $0x78] sm:$0xff] %v937_v47  ;;  %985 = vst [vmem:[#allocation2 + $0xf8] sm:$0xff] %v953_v48  ;;  %v1042_v13 = vadd.f32 (!%p1246_p13), %v1775_v50, %v1003_v10  ;;  %v1019_v44 = vld [vmem:[#allocation2 + $0xe8] sm:$0xff] (!%p1246_p13) }
 0x17b   : > { %1073 = vst [vmem:[%s1718_s30 + $0x60] sm:$0xff] %v1041_v12  ;;  %1084 = vst [vmem:[%s1718_s30 + $0xb8] sm:$0xff] %v1052_v35  ;;  %v1058_v47 = vadd.f32 %v1775_v50, %v1019_v44 }
 0x17c   : > { %1074 = vst [vmem:[%s1718_s30 + $0x68] sm:$0xff] %v1042_v13  ;;  %1085 = vst [vmem:[%s1718_s30 + $0xc0] sm:$0xff] %v1053_v36 }
 0x17d   : > { %1086 = vst [vmem:[%s1718_s30 + $0xc8] sm:$0xff] %v1054_v37  ;;  %1087 = vst [vmem:[%s1718_s30 + $0xd0] sm:$0xff] %v1055_v41 }
 0x17e   : > { %1088 = vst [vmem:[%s1718_s30 + $0xd8] sm:$0xff] %v1056_v42  ;;  %1089 = vst [vmem:[%s1718_s30 + $0xe0] sm:$0xff] %v1057_v43 }
 0x17f   : > { %v1004_v14 = vld [vmem:[#allocation2 + $0x70] sm:$0xff]  ;;  %1090 = vst [vmem:[%s1718_s30 + $0xe8] sm:$0xff] %v1058_v47 }
 0x180   : > { %v1043_v17 = vadd.f32 %v1775_v50, %v1004_v14  ;;  %v1020_v45 = vld [vmem:[#allocation2 + $0xf0] sm:$0xff] }
 0x181   : > { %v1005_v15 = vld [vmem:[#allocation2 + $0x78] sm:$0xff]  ;;  %v1059_v48 = vadd.f32 %v1775_v50, %v1020_v45 }
 0x182   : > { %v1044_v18 = vadd.f32 %v1775_v50, %v1005_v15  ;;  %1075 = vst [vmem:[%s1718_s30 + $0x70] sm:$0xff] %v1043_v17  ;;  %v1021_v46 = vld [vmem:[#allocation2 + $0xf8] sm:$0xff] }
 0x183   : > { %v1060_v49 = vadd.f32 %v1775_v50, %v1021_v46  ;;  %1091 = vst [vmem:[%s1718_s30 + $0xf0] sm:$0xff] %v1059_v48 }
 0x184   : > { %1076 = vst [vmem:[%s1718_s30 + $0x78] sm:$0xff] %v1044_v18 }
 0x185   : > { %1092 = vst [vmem:[%s1718_s30 + $0xf8] sm:$0xff] %v1060_v49 }
 0x186 PF: > { %s13_s18 = sadd.s32 1, %s1554_s18   ;;  %s1866_s12 = smov %s1534_s13 }
 0x187   : > { %p10_p0 = scmp.ge.s32.totalorder %s13_s18, 6   ;;  %s1867_s13 = smov %s1628_s25 }
 0x188   : > { %s1868_s14 = smov %s1546_s16  ;;  %s1869_s15 = smov %s1550_s17 }
 0x189   : > { %s1870_s16 = smov %s1873_s19  ;;  %s1871_s17 = smov %s1877_s20 }
 0x18a   :  { %12 = sbr.rel (!%p10_p0) target bundleno = 4 (0x4), region = 116 }

</bundles_post_ra>
